<compile_context>
chip_gen: v7x
topology: tpu7x:2x2x1
jax: 0.10.0
libtpu: 0.0.40
codegen_flags: <defaults>
</compile_context>

<pallas_src>
import functools

import jax
import jax.numpy as jnp
from jax import lax
from jax.experimental import pallas as pl
from jax.experimental.pallas import tpu as pltpu

EPS = 1e-5


def _round_up(x, m):
    return (x + m - 1) // m * m


# ---------------------------------------------------------------------------
# Phase 1: batch statistics -> fused (scale, shift) vectors.
# ---------------------------------------------------------------------------
def _bn_stats_kernel(x_ref, gamma_ref, beta_ref, scale_ref, shift_ref,
                     sum_ref, ssq_ref, *, inv_n, eps):
    i = pl.program_id(0)

    @pl.when(i == 0)
    def _init():
        sum_ref[...] = jnp.zeros_like(sum_ref)
        ssq_ref[...] = jnp.zeros_like(ssq_ref)

    x = x_ref[...].astype(jnp.float32)                       # [bn, Dp]
    sum_ref[...] += jnp.sum(x, axis=0, keepdims=True)        # [1, Dp]
    ssq_ref[...] += jnp.sum(x * x, axis=0, keepdims=True)    # [1, Dp]

    @pl.when(i == pl.num_programs(0) - 1)
    def _finalize():
        mean = sum_ref[...] * inv_n
        var = jnp.maximum(ssq_ref[...] * inv_n - mean * mean, 0.0)
        inv_std = lax.rsqrt(var + eps)
        scale = gamma_ref[...].astype(jnp.float32) * inv_std
        scale_ref[...] = scale
        shift_ref[...] = beta_ref[...].astype(jnp.float32) - mean * scale


# ---------------------------------------------------------------------------
# Phase 2: normalize (one FMA/element) + classifier matmul on the MXU.
# ---------------------------------------------------------------------------
def _bn_apply_kernel(x_ref, scale_ref, shift_ref, w_ref, feat_ref, score_ref):
    x = x_ref[...].astype(jnp.float32)                       # [bn, Dp]
    feat = x * scale_ref[...] + shift_ref[...]               # fused scale/shift
    feat_ref[...] = feat.astype(feat_ref.dtype)
    # weight is [Cp, Dp] (PyTorch layout); contract D with D -> [bn, Cp].
    score_ref[...] = lax.dot_general(
        feat.astype(w_ref.dtype), w_ref[...],
        dimension_numbers=(((1,), (1,)), ((), ())),
        preferred_element_type=jnp.float32,
    ).astype(score_ref.dtype)


# ---------------------------------------------------------------------------
# Wrapper
# ---------------------------------------------------------------------------
def bn_classifier(x, gamma, beta, weight, *, eps=EPS, block_n=None,
                  mxu_dtype=jnp.bfloat16, feature_dtype=None):
    """x: [N, D]; gamma/beta: [D]; weight: [C, D] (PyTorch layout).

    Returns (feature [N, D], cls_score [N, C]) matching BNClassifier.forward
    in training mode.
    """
    n, d = x.shape
    c, d2 = weight.shape
    assert d == d2, "weight must be [class_num, in_dim]"
    feature_dtype = x.dtype if feature_dtype is None else feature_dtype

    d_pad = _round_up(d, 128)          # lane-dense feature dim
    c_pad = _round_up(c, 128)          # lane-dense class dim

    x_isz = jnp.dtype(x.dtype).itemsize
    f_isz = jnp.dtype(feature_dtype).itemsize
    w_isz = jnp.dtype(mxu_dtype).itemsize

    if block_n is None:
        # Size the row tile so the double-buffered working set stays well
        # inside v7x's 64 MiB physical VMEM (and v5e/v6e scoped defaults).
        budget = 24 * 1024 * 1024
        per_row = 2 * d_pad * x_isz + 2 * d_pad * f_isz + 2 * c_pad * 4
        block_n = max(8, min(1024, (budget // per_row) // 8 * 8))
    block_n = int(min(block_n, _round_up(n, 8)))
    block_n = max(8, block_n // 8 * 8)
    n_pad = _round_up(n, block_n)
    nt = n_pad // block_n

    # Zero padding: padded rows/cols contribute 0 to the sums; gamma/beta pads
    # are 0 so padded feature columns come out exactly 0.
    xp = jnp.pad(x, ((0, n_pad - n), (0, d_pad - d)))
    g2 = jnp.pad(gamma.astype(jnp.float32).reshape(1, d), ((0, 0), (0, d_pad - d)))
    b2 = jnp.pad(beta.astype(jnp.float32).reshape(1, d), ((0, 0), (0, d_pad - d)))
    wp = jnp.pad(weight, ((0, c_pad - c), (0, d_pad - d))).astype(mxu_dtype)

    vmem_est = (2 * block_n * d_pad * x_isz          # x double buffer
                + 2 * block_n * d_pad * f_isz        # feature double buffer
                + 2 * block_n * c_pad * 4            # score double buffer
                + 2 * c_pad * d_pad * w_isz          # resident weight (x2 bufs)
                + 16 * d_pad * 4                     # scale/shift/sum/ssq
                + (4 << 20))                         # headroom
    vmem_limit = int(min(max(vmem_est, 32 << 20), 64 << 20))

    # ---- phase 1: statistics ------------------------------------------------
    scale, shift = pl.pallas_call(
        functools.partial(_bn_stats_kernel, inv_n=1.0 / n, eps=float(eps)),
        out_shape=(jax.ShapeDtypeStruct((1, d_pad), jnp.float32),
                   jax.ShapeDtypeStruct((1, d_pad), jnp.float32)),
        grid_spec=pltpu.PrefetchScalarGridSpec(
            num_scalar_prefetch=0,
            grid=(nt,),
            in_specs=[pl.BlockSpec((block_n, d_pad), lambda i: (i, 0)),
                      pl.BlockSpec((1, d_pad), lambda i: (0, 0)),
                      pl.BlockSpec((1, d_pad), lambda i: (0, 0))],
            out_specs=(pl.BlockSpec((1, d_pad), lambda i: (0, 0)),
                       pl.BlockSpec((1, d_pad), lambda i: (0, 0))),
            scratch_shapes=[pltpu.VMEM((1, d_pad), jnp.float32),
                            pltpu.VMEM((1, d_pad), jnp.float32)],
        ),
        compiler_params=pltpu.CompilerParams(
            dimension_semantics=("arbitrary",),
            vmem_limit_bytes=vmem_limit),
        cost_estimate=pl.CostEstimate(
            flops=3 * n_pad * d_pad,
            transcendentals=d_pad,
            bytes_accessed=n_pad * d_pad * x_isz + 16 * d_pad),
    )(xp, g2, b2)

    # ---- phase 2: normalize + classifier matmul -----------------------------
    feat_p, score_p = pl.pallas_call(
        _bn_apply_kernel,
        out_shape=(jax.ShapeDtypeStruct((n_pad, d_pad), feature_dtype),
                   jax.ShapeDtypeStruct((n_pad, c_pad), jnp.float32)),
        grid_spec=pltpu.PrefetchScalarGridSpec(
            num_scalar_prefetch=0,
            grid=(nt,),
            in_specs=[pl.BlockSpec((block_n, d_pad), lambda i: (i, 0)),
                      pl.BlockSpec((1, d_pad), lambda i: (0, 0)),
                      pl.BlockSpec((1, d_pad), lambda i: (0, 0)),
                      pl.BlockSpec((c_pad, d_pad), lambda i: (0, 0))],
            out_specs=(pl.BlockSpec((block_n, d_pad), lambda i: (i, 0)),
                       pl.BlockSpec((block_n, c_pad), lambda i: (i, 0))),
        ),
        compiler_params=pltpu.CompilerParams(
            dimension_semantics=("parallel",),
            vmem_limit_bytes=vmem_limit),
        cost_estimate=pl.CostEstimate(
            flops=2 * n_pad * d_pad * c_pad + 2 * n_pad * d_pad,
            transcendentals=0,
            bytes_accessed=(n_pad * d_pad * x_isz
                            + n_pad * d_pad * f_isz
                            + n_pad * c_pad * 4
                            + c_pad * d_pad * w_isz)),
    )(xp, scale, shift, wp)

    return feat_p[:n, :d], score_p[:n, :c]


# ---------------------------------------------------------------------------
# Pure-JAX reference (PyTorch BatchNorm1d training semantics + Linear, no bias)
# ---------------------------------------------------------------------------
def reference(x, gamma, beta, weight, eps=EPS):
    mean = jnp.mean(x, axis=0, keepdims=True)
    var = jnp.mean((x - mean) ** 2, axis=0, keepdims=True)   # biased variance
    feat = (x - mean) / jnp.sqrt(var + eps) * gamma[None, :] + beta[None, :]
    return feat, feat @ weight.T


if __name__ == "__main__":
    # Shapes consistent with BNClassifier(in_dim=32, class_num=16).
    batch, in_dim, class_num = 8, 32, 16

    key = jax.random.PRNGKey(0)
    kx, kw = jax.random.split(key)

    x = jax.random.normal(kx, (batch, in_dim), dtype=jnp.float32)

    # Deterministic parameter init mirroring _init_params():
    #   BN: weight = 1, bias = 0;  Linear: weight ~ N(0, 0.001), no bias.
    gamma = jnp.ones((in_dim,), dtype=jnp.float32)
    beta = jnp.zeros((in_dim,), dtype=jnp.float32)
    weight = 0.001 * jax.random.normal(kw, (class_num, in_dim), dtype=jnp.float32)

    feature, cls_score = jax.jit(bn_classifier)(x, gamma, beta, weight)
    jax.block_until_ready((feature, cls_score))

    ref_feat, ref_score = reference(x, gamma, beta, weight)

    assert feature.shape == (batch, in_dim)
    assert cls_score.shape == (batch, class_num)

    # Feature path is pure f32 (rsqrt vs sqrt/div ordering only).
    assert jnp.allclose(feature, ref_feat, atol=1e-4, rtol=1e-4)

    # Score uses bf16 MXU operands with f32 accumulation -> loosened absolute
    # tolerance vs the all-f32 reference (weights ~ N(0, 0.001), scores ~6e-3).
    assert jnp.allclose(cls_score, ref_score, atol=2e-3, rtol=0.0)

    # Tighter check against a reference that applies the same bf16 operand
    # rounding: confirms the only deviation is MXU operand precision.
    ref_score_bf16 = (feature.astype(jnp.bfloat16).astype(jnp.float32)
                      @ weight.astype(jnp.bfloat16).astype(jnp.float32).T)
    assert jnp.allclose(cls_score, ref_score_bf16, atol=1e-4, rtol=1e-3)

    print("KERNEL_OK")
</pallas_src>

<mosaic_0001>
module attributes {stable_mosaic.version = 11 : i64} {
  func.func @_bn_stats_kernel(%arg0: i32, %arg1: memref<8x128xf32, #tpu.memory_space<vmem>>, %arg2: memref<1x128xf32, #tpu.memory_space<vmem>>, %arg3: memref<1x128xf32, #tpu.memory_space<vmem>>, %arg4: memref<1x128xf32, #tpu.memory_space<vmem>>, %arg5: memref<1x128xf32, #tpu.memory_space<vmem>>, %arg6: memref<1x128xf32, #tpu.memory_space<vmem>>, %arg7: memref<1x128xf32, #tpu.memory_space<vmem>>) attributes {dimension_semantics = [#tpu.dimension_semantics<arbitrary>], iteration_bounds = array<i64: 1>, scalar_prefetch = 0 : i64, scratch_operands = 2 : i64, tpu.core_type = #tpu.core_type<tc>, window_params = [{transform_indices = @transform_0, window_bounds = array<i64: 8, 128>}, {pipeline_mode = #tpu.pipeline_mode<synchronous>, transform_indices = @transform_1, window_bounds = array<i64: 1, 128>}, {pipeline_mode = #tpu.pipeline_mode<synchronous>, transform_indices = @transform_2, window_bounds = array<i64: 1, 128>}, {pipeline_mode = #tpu.pipeline_mode<synchronous>, transform_indices = @transform_3, window_bounds = array<i64: 1, 128>}, {pipeline_mode = #tpu.pipeline_mode<synchronous>, transform_indices = @transform_4, window_bounds = array<i64: 1, 128>}]} {
    %c0_i32 = arith.constant 0 : i32
    %0 = arith.cmpi eq, %arg0, %c0_i32 : i32
    %1 = arith.extui %0 : i1 to i32
    %c0_i32_0 = arith.constant 0 : i32
    %2 = arith.cmpi ne, %1, %c0_i32_0 : i32
    scf.if %2 {
      %cst_13 = arith.constant 0.000000e+00 : f32
      %18 = vector.broadcast %cst_13 : f32 to vector<1x128xf32>
      %c0_14 = arith.constant 0 : index
      %c0_15 = arith.constant 0 : index
      %19 = vector.load %arg6[%c0_14, %c0_15] : memref<1x128xf32, #tpu.memory_space<vmem>>, vector<1x128xf32>
      tpu.vector_store %arg6[%c0_14, %c0_15], %18 {strides = array<i32>} : memref<1x128xf32, #tpu.memory_space<vmem>>, vector<1x128xf32>,
      %cst_16 = arith.constant 0.000000e+00 : f32
      %20 = vector.broadcast %cst_16 : f32 to vector<1x128xf32>
      %c0_17 = arith.constant 0 : index
      %c0_18 = arith.constant 0 : index
      %21 = vector.load %arg7[%c0_17, %c0_18] : memref<1x128xf32, #tpu.memory_space<vmem>>, vector<1x128xf32>
      tpu.vector_store %arg7[%c0_17, %c0_18], %20 {strides = array<i32>} : memref<1x128xf32, #tpu.memory_space<vmem>>, vector<1x128xf32>,
    } else {
    }
    %c0 = arith.constant 0 : index
    %c0_1 = arith.constant 0 : index
    %3 = vector.load %arg1[%c0, %c0_1] : memref<8x128xf32, #tpu.memory_space<vmem>>, vector<8x128xf32>
    %c0_2 = arith.constant 0 : index
    %c0_3 = arith.constant 0 : index
    %4 = vector.load %arg6[%c0_2, %c0_3] : memref<1x128xf32, #tpu.memory_space<vmem>>, vector<1x128xf32>
    %cst = arith.constant dense<0.000000e+00> : vector<128xf32>
    %5 = vector.multi_reduction <add>, %3, %cst [0] : vector<8x128xf32> to vector<128xf32>
    %6 = vector.shape_cast %5 : vector<128xf32> to vector<1x128xf32>
    %7 = arith.addf %4, %6 : vector<1x128xf32>
    %c0_4 = arith.constant 0 : index
    %c0_5 = arith.constant 0 : index
    %8 = vector.load %arg6[%c0_4, %c0_5] : memref<1x128xf32, #tpu.memory_space<vmem>>, vector<1x128xf32>
    tpu.vector_store %arg6[%c0_4, %c0_5], %7 {strides = array<i32>} : memref<1x128xf32, #tpu.memory_space<vmem>>, vector<1x128xf32>,
    %c0_6 = arith.constant 0 : index
    %c0_7 = arith.constant 0 : index
    %9 = vector.load %arg7[%c0_6, %c0_7] : memref<1x128xf32, #tpu.memory_space<vmem>>, vector<1x128xf32>
    %10 = arith.mulf %3, %3 : vector<8x128xf32>
    %cst_8 = arith.constant dense<0.000000e+00> : vector<128xf32>
    %11 = vector.multi_reduction <add>, %10, %cst_8 [0] : vector<8x128xf32> to vector<128xf32>
    %12 = vector.shape_cast %11 : vector<128xf32> to vector<1x128xf32>
    %13 = arith.addf %9, %12 : vector<1x128xf32>
    %c0_9 = arith.constant 0 : index
    %c0_10 = arith.constant 0 : index
    %14 = vector.load %arg7[%c0_9, %c0_10] : memref<1x128xf32, #tpu.memory_space<vmem>>, vector<1x128xf32>
    tpu.vector_store %arg7[%c0_9, %c0_10], %13 {strides = array<i32>} : memref<1x128xf32, #tpu.memory_space<vmem>>, vector<1x128xf32>,
    %c0_i32_11 = arith.constant 0 : i32
    %15 = arith.cmpi eq, %arg0, %c0_i32_11 : i32
    %16 = arith.extui %15 : i1 to i32
    %c0_i32_12 = arith.constant 0 : i32
    %17 = arith.cmpi ne, %16, %c0_i32_12 : i32
    scf.if %17 {
      %c0_13 = arith.constant 0 : index
      %c0_14 = arith.constant 0 : index
      %18 = vector.load %arg6[%c0_13, %c0_14] : memref<1x128xf32, #tpu.memory_space<vmem>>, vector<1x128xf32>
      %cst_15 = arith.constant 1.250000e-01 : f32
      %19 = vector.broadcast %cst_15 : f32 to vector<1x128xf32>
      %20 = arith.mulf %18, %19 : vector<1x128xf32>
      %c0_16 = arith.constant 0 : index
      %c0_17 = arith.constant 0 : index
      %21 = vector.load %arg7[%c0_16, %c0_17] : memref<1x128xf32, #tpu.memory_space<vmem>>, vector<1x128xf32>
      %cst_18 = arith.constant 1.250000e-01 : f32
      %22 = vector.broadcast %cst_18 : f32 to vector<1x128xf32>
      %23 = arith.mulf %21, %22 : vector<1x128xf32>
      %24 = arith.mulf %20, %20 : vector<1x128xf32>
      %25 = arith.subf %23, %24 : vector<1x128xf32>
      %cst_19 = arith.constant 0.000000e+00 : f32
      %26 = vector.broadcast %cst_19 : f32 to vector<1x128xf32>
      %27 = arith.maximumf %25, %26 : vector<1x128xf32>
      %cst_20 = arith.constant 9.99999974E-6 : f32
      %28 = vector.broadcast %cst_20 : f32 to vector<1x128xf32>
      %29 = arith.addf %27, %28 : vector<1x128xf32>
      %30 = math.rsqrt %29 : vector<1x128xf32>
      %c0_21 = arith.constant 0 : index
      %c0_22 = arith.constant 0 : index
      %31 = vector.load %arg2[%c0_21, %c0_22] : memref<1x128xf32, #tpu.memory_space<vmem>>, vector<1x128xf32>
      %32 = arith.mulf %31, %30 : vector<1x128xf32>
      %c0_23 = arith.constant 0 : index
      %c0_24 = arith.constant 0 : index
      %33 = vector.load %arg4[%c0_23, %c0_24] : memref<1x128xf32, #tpu.memory_space<vmem>>, vector<1x128xf32>
      tpu.vector_store %arg4[%c0_23, %c0_24], %32 {strides = array<i32>} : memref<1x128xf32, #tpu.memory_space<vmem>>, vector<1x128xf32>,
      %c0_25 = arith.constant 0 : index
      %c0_26 = arith.constant 0 : index
      %34 = vector.load %arg3[%c0_25, %c0_26] : memref<1x128xf32, #tpu.memory_space<vmem>>, vector<1x128xf32>
      %35 = arith.mulf %20, %32 : vector<1x128xf32>
      %36 = arith.subf %34, %35 : vector<1x128xf32>
      %c0_27 = arith.constant 0 : index
      %c0_28 = arith.constant 0 : index
      %37 = vector.load %arg5[%c0_27, %c0_28] : memref<1x128xf32, #tpu.memory_space<vmem>>, vector<1x128xf32>
      tpu.vector_store %arg5[%c0_27, %c0_28], %36 {strides = array<i32>} : memref<1x128xf32, #tpu.memory_space<vmem>>, vector<1x128xf32>,
    } else {
    }
    return
  }
  func.func @transform_0(%arg0: i32) -> (i32, i32) {
    %c0_i32 = arith.constant 0 : i32
    %c0_i32_0 = arith.constant 0 : i32
    return %arg0, %c0_i32 : i32, i32
  }
  func.func @transform_1(%arg0: i32) -> (i32, i32) {
    %c0_i32 = arith.constant 0 : i32
    %c0_i32_0 = arith.constant 0 : i32
    %c0_i32_1 = arith.constant 0 : i32
    return %c0_i32, %c0_i32_0 : i32, i32
  }
  func.func @transform_2(%arg0: i32) -> (i32, i32) {
    %c0_i32 = arith.constant 0 : i32
    %c0_i32_0 = arith.constant 0 : i32
    %c0_i32_1 = arith.constant 0 : i32
    return %c0_i32, %c0_i32_0 : i32, i32
  }
  func.func @transform_3(%arg0: i32) -> (i32, i32) {
    %c0_i32 = arith.constant 0 : i32
    %c0_i32_0 = arith.constant 0 : i32
    %c0_i32_1 = arith.constant 0 : i32
    return %c0_i32, %c0_i32_0 : i32, i32
  }
  func.func @transform_4(%arg0: i32) -> (i32, i32) {
    %c0_i32 = arith.constant 0 : i32
    %c0_i32_0 = arith.constant 0 : i32
    %c0_i32_1 = arith.constant 0 : i32
    return %c0_i32, %c0_i32_0 : i32, i32
  }
}

module attributes {stable_mosaic.version = 11 : i64} {
  func.func @_bn_apply_kernel(%arg0: i32, %arg1: memref<8x128xf32, #tpu.memory_space<vmem>>, %arg2: memref<1x128xf32, #tpu.memory_space<vmem>>, %arg3: memref<1x128xf32, #tpu.memory_space<vmem>>, %arg4: memref<128x128xbf16, #tpu.memory_space<vmem>>, %arg5: memref<8x128xf32, #tpu.memory_space<vmem>>, %arg6: memref<8x128xf32, #tpu.memory_space<vmem>>) attributes {dimension_semantics = [#tpu.dimension_semantics<parallel>], iteration_bounds = array<i64: 1>, scalar_prefetch = 0 : i64, scratch_operands = 0 : i64, tpu.core_type = #tpu.core_type<tc>, window_params = [{transform_indices = @transform_0, window_bounds = array<i64: 8, 128>}, {pipeline_mode = #tpu.pipeline_mode<synchronous>, transform_indices = @transform_1, window_bounds = array<i64: 1, 128>}, {pipeline_mode = #tpu.pipeline_mode<synchronous>, transform_indices = @transform_2, window_bounds = array<i64: 1, 128>}, {pipeline_mode = #tpu.pipeline_mode<synchronous>, transform_indices = @transform_3, window_bounds = array<i64: 128, 128>}, {transform_indices = @transform_4, window_bounds = array<i64: 8, 128>}, {transform_indices = @transform_5, window_bounds = array<i64: 8, 128>}]} {
    %c0 = arith.constant 0 : index
    %c0_0 = arith.constant 0 : index
    %0 = vector.load %arg1[%c0, %c0_0] : memref<8x128xf32, #tpu.memory_space<vmem>>, vector<8x128xf32>
    %c0_1 = arith.constant 0 : index
    %c0_2 = arith.constant 0 : index
    %1 = vector.load %arg2[%c0_1, %c0_2] : memref<1x128xf32, #tpu.memory_space<vmem>>, vector<1x128xf32>
    %2 = vector.broadcast %1 : vector<1x128xf32> to vector<8x128xf32>
    %3 = arith.mulf %0, %2 : vector<8x128xf32>
    %c0_3 = arith.constant 0 : index
    %c0_4 = arith.constant 0 : index
    %4 = vector.load %arg3[%c0_3, %c0_4] : memref<1x128xf32, #tpu.memory_space<vmem>>, vector<1x128xf32>
    %5 = vector.broadcast %4 : vector<1x128xf32> to vector<8x128xf32>
    %6 = arith.addf %3, %5 : vector<8x128xf32>
    %c0_5 = arith.constant 0 : index
    %c0_6 = arith.constant 0 : index
    %7 = vector.load %arg5[%c0_5, %c0_6] : memref<8x128xf32, #tpu.memory_space<vmem>>, vector<8x128xf32>
    tpu.vector_store %arg5[%c0_5, %c0_6], %6 {strides = array<i32>} : memref<8x128xf32, #tpu.memory_space<vmem>>, vector<8x128xf32>,
    %8 = arith.truncf %6 : vector<8x128xf32> to vector<8x128xbf16>
    %c0_7 = arith.constant 0 : index
    %c0_8 = arith.constant 0 : index
    %9 = vector.load %arg4[%c0_7, %c0_8] : memref<128x128xbf16, #tpu.memory_space<vmem>>, vector<128x128xbf16>
    %cst = arith.constant dense<0.000000e+00> : vector<8x128xf32>
    %10 = tpu.matmul %8, %9, %cst {dimension_numbers = #tpu.dot_dimension_numbers<[1], [1], [0], [0], [0, 0, 1, 0], [], []>} : vector<8x128xbf16>, vector<128x128xbf16>, vector<8x128xf32> -> vector<8x128xf32>
    %c0_9 = arith.constant 0 : index
    %c0_10 = arith.constant 0 : index
    %11 = vector.load %arg6[%c0_9, %c0_10] : memref<8x128xf32, #tpu.memory_space<vmem>>, vector<8x128xf32>
    tpu.vector_store %arg6[%c0_9, %c0_10], %10 {strides = array<i32>} : memref<8x128xf32, #tpu.memory_space<vmem>>, vector<8x128xf32>,
    return
  }
  func.func @transform_0(%arg0: i32) -> (i32, i32) {
    %c0_i32 = arith.constant 0 : i32
    %c0_i32_0 = arith.constant 0 : i32
    return %arg0, %c0_i32 : i32, i32
  }
  func.func @transform_1(%arg0: i32) -> (i32, i32) {
    %c0_i32 = arith.constant 0 : i32
    %c0_i32_0 = arith.constant 0 : i32
    %c0_i32_1 = arith.constant 0 : i32
    return %c0_i32, %c0_i32_0 : i32, i32
  }
  func.func @transform_2(%arg0: i32) -> (i32, i32) {
    %c0_i32 = arith.constant 0 : i32
    %c0_i32_0 = arith.constant 0 : i32
    %c0_i32_1 = arith.constant 0 : i32
    return %c0_i32, %c0_i32_0 : i32, i32
  }
  func.func @transform_3(%arg0: i32) -> (i32, i32) {
    %c0_i32 = arith.constant 0 : i32
    %c0_i32_0 = arith.constant 0 : i32
    %c0_i32_1 = arith.constant 0 : i32
    return %c0_i32, %c0_i32_0 : i32, i32
  }
  func.func @transform_4(%arg0: i32) -> (i32, i32) {
    %c0_i32 = arith.constant 0 : i32
    %c0_i32_0 = arith.constant 0 : i32
    return %arg0, %c0_i32 : i32, i32
  }
  func.func @transform_5(%arg0: i32) -> (i32, i32) {
    %c0_i32 = arith.constant 0 : i32
    %c0_i32_0 = arith.constant 0 : i32
    return %arg0, %c0_i32 : i32, i32
  }
}

</mosaic_0001>

<bundles_post_ra>
// kernel: bn_classifier.3
= control target key start
LH: loop header
LB: loop body
LE: loop exit
PB: predicated region body
PF: predicated region fallthrough
CT: control target
= control target key end

     0   :  { %11 = vsyncpa [#allocation3], 0  ;;  %v273_v1 = vmov 0.0   ;;  %vm274_vm0 = vmmov 0   ;;  %s364_s0 = inlined_call_operand.vmem [shape: f32[8,128], index: 0, kind: input, shape index: {}]   ;;  %s365_s1 = inlined_call_operand.vmem [shape: f32[1,128], index: 1, kind: input, shape index: {}]   ;;  %s366_s2 = inlined_call_operand.vmem [shape: f32[1,128], index: 2, kind: input, shape index: {}]   ;;  %s367_s3 = inlined_call_operand.vmem [shape: bf16[128,128], index: 3, kind: input, shape index: {}]   ;;  %s368_s4 = inlined_call_operand.hbm [shape: f32[8,128], index: 4, kind: output, shape index: {0}]   ;;  %s369_s5 = inlined_call_operand.hbm [shape: f32[8,128], index: 5, kind: output, shape index: {1}]  }
   0x1   :  { %v217_v0 = vld [vmem:[%s367_s3] sm:$0xff]   ;;  %193 = vmatprep.subr.bf16.mxu0 %v273_v1  ;;  %209 = vmatprep.mubr.msk.bf16.mxu0 %vm274_vm0, %v273_v1  ;;  %v218_v2 = vld [vmem:[%s367_s3 + $0x8] sm:$0xff]  }
   0x2   :  { %194 = vmatpush3.bf16.xpose.msra.mxu0 %v217_v0  ;;  %v22_v3 = vld [vmem:[%s364_s0] sm:$0xff] }
   0x3   :  { %195 = vmatprep.subr.bf16.mxu0 %v273_v1  ;;  %v174_v4 = vld [vmem:[%s365_s1] ss:$0 sm:$0xff] }
   0x4   :  { %v175_v5 = vld [vmem:[%s366_s2] ss:$0 sm:$0xff]  ;;  %v30_v6 = vmul.f32 %v174_v4, %v22_v3 }
   0x5   :  { %12 = vsyncpa [#allocation5], 0  ;;  %v219_v8 = vld [vmem:[%s367_s3 + $0x10] sm:$0xff]   ;;  %v220_v9 = vld [vmem:[%s367_s3 + $0x18] sm:$0xff]   ;;  %s275_s12 = smov [#allocation2]  }
   0x6   :  { %v38_v7 = vadd.f32 %v175_v5, %v30_v6  ;;  %v221_v10 = vld [vmem:[%s367_s3 + $0x20] sm:$0xff]   ;;  %v222_v11 = vld [vmem:[%s367_s3 + $0x28] sm:$0xff]   ;;  %v223_v12 = vld [vmem:[%s367_s3 + $0x30] sm:$0xff]   ;;  %s152_s13 = sshll.u32 %s275_s12, 4  ;;  %s153_s13 = int_to_ptr.vmem [resolvable:$true] %s152_s13 }
   0x7   :  { %v224_v13 = vld [vmem:[%s367_s3 + $0x38] sm:$0xff]   ;;  %s225_s14 = scalar_lea.vmem %s153_s13, 128  ;;  %p230_p1 = scmp.lt.s32.totalorder %s153_s13, %s153_s13 }
   0x8   :  { %39 = vst [vmem:[#allocation2] sm:$0xff] %v38_v7  ;;  %v40_v14 = vpack.c.bf16 %v38_v7, %v38_v7  ;;  %p226_p0 = scmp.ne.s32.totalorder %s153_s13, %s225_s14  ;;  %p231_p2 = scmp.lt.s32.totalorder %s225_s14, %s225_s14 }
   0xa   :  { %196 = vmatpush3.bf16.xpose.msra.mxu0 %v218_v2  ;;  %p232_p3 = por %p231_p2, %p230_p1 }
   0xb   :  { %197 = vmatprep.subr.bf16.mxu0 %v273_v1 }
   0xc   :  { %p233_p4 = pnand %p232_p3, %p226_p0 }
  0x12   :  { %198 = vmatpush3.bf16.xpose.msra.mxu0 %v219_v8 }
  0x13   :  { %199 = vmatprep.subr.bf16.mxu0 %v273_v1 }
  0x1a   :  { %200 = vmatpush3.bf16.xpose.msra.mxu0 %v220_v9 }
  0x1b   :  { %201 = vmatprep.subr.bf16.mxu0 %v273_v1 }
  0x22   :  { %202 = vmatpush3.bf16.xpose.msra.mxu0 %v221_v10 }
  0x23   :  { %203 = vmatprep.subr.bf16.mxu0 %v273_v1 }
  0x2a   :  { %204 = vmatpush3.bf16.xpose.msra.mxu0 %v222_v11 }
  0x2b   :  { %205 = vmatprep.subr.bf16.mxu0 %v273_v1 }
  0x32   :  { %206 = vmatpush3.bf16.xpose.msra.mxu0 %v223_v12 }
  0x33   :  { %207 = vmatprep.subr.bf16.mxu0 %v273_v1 }
  0x3a   :  { %208 = vmatpush3.bf16.xpose.msra.mxu0 %v224_v13 }
  0x41   :  { %210 = vmatmul.mubr.bf16.vlgmr.msra.gmra.mrb[0].mxu0 %v40_v14 }
  0x42   :  { %236 = shalt.err (!%p233_p4)
}
  0x43   :  { %s237_s17 = scalar_lea.hbm %s368_s4, 128 }
  0x44   :  { %p238_p5 = scmp.ne.s32.totalorder %s368_s4, %s237_s17  ;;  %p241_p6 = scmp.lt.u32.totalorder %s237_s17, %s368_s4 }
  0x46   :  { %p243_p7 = pnand %p241_p6, %p238_p5 }
  0x48   :  { %246 = shalt.err (!%p243_p7)
}
  0x49   :  { %155 = dma.vmem_to_hbm [thread:$0]  %s153_s13, 128, %s368_s4, [#allocation3]  }
  0x4a   :  { %s276_s23 = smov [#allocation4]  }
  0x4b   :  { %s162_s24 = sshll.u32 %s276_s23, 4  ;;  %s163_s24 = int_to_ptr.vmem [resolvable:$true] %s162_s24 }
  0x4c   :  { %s247_s25 = scalar_lea.vmem %s163_s24, 128  ;;  %p252_p9 = scmp.lt.s32.totalorder %s163_s24, %s163_s24 }
  0x4d   :  { %p248_p8 = scmp.ne.s32.totalorder %s163_s24, %s247_s25  ;;  %p253_p10 = scmp.lt.s32.totalorder %s247_s25, %s247_s25 }
  0x4f   :  { %p254_p11 = por %p253_p10, %p252_p9 }
  0x51   :  { %p255_p12 = pnand %p254_p11, %p248_p8 }
 0x114   :  { %v139_v15 = vpop.f32.mrb[0].mxu0 }
 0x115   :  { %145 = vst [vmem:[#allocation4] sm:$0xff] %v139_v15  ;;  %v211_v16 = vpop.f32.mrb[1].mxu0 }
 0x116   :  { %v142_v17 = vpop.f32.mrb[2].mxu0 }
 0x117   :  { %258 = shalt.err (!%p255_p12)
}
 0x118   :  { %s259_s28 = scalar_lea.hbm %s369_s5, 128 }
 0x119   :  { %p260_p13 = scmp.ne.s32.totalorder %s369_s5, %s259_s28  ;;  %p263_p0 = scmp.lt.u32.totalorder %s259_s28, %s369_s5 }
 0x11b   :  { %p265_p1 = pnand %p263_p0, %p260_p13 }
 0x11d   :  { %268 = shalt.err (!%p265_p1)
}
 0x11e   :  { %165 = dma.vmem_to_hbm [thread:$0]  %s163_s24, 128, %s369_s5, [#allocation5]   ;;  %v212_v18 = vpop.f32.mrb[3].mxu0 }
 0x11f   :  { %269 = dma.done.wait [#allocation3], 128  }
 0x120   :  { %270 = vsyncadd [#allocation3], 4294967168 }
 0x121   :  { %271 = dma.done.wait [#allocation5], 128  }
 0x122   :  { %272 = vsyncadd [#allocation5], 4294967168 }
 0x123   :  { %172 = vsyncpa [#allocation3], 1 }
 0x124   :  { %173 = vsyncpa [#allocation5], 1 }

// kernel: bn_classifier.2
= control target key start
LH: loop header
LB: loop body
LE: loop exit
PB: predicated region body
PF: predicated region fallthrough
CT: control target
= control target key end

     0   :  { %v72_v0 = vmov 0.0   ;;  %s113_s0 = inlined_call_operand.vmem [shape: f32[8,128], index: 0, kind: input, shape index: {}]   ;;  %s114_s1 = inlined_call_operand.vmem [shape: f32[1,128], index: 1, kind: input, shape index: {}]   ;;  %s115_s2 = inlined_call_operand.vmem [shape: f32[1,128], index: 2, kind: input, shape index: {}]   ;;  %s116_s3 = inlined_call_operand.vmem [shape: f32[1,128], index: 3, kind: output, shape index: {0}]   ;;  %s117_s4 = inlined_call_operand.vmem [shape: f32[1,128], index: 4, kind: output, shape index: {1}]  }
   0x1   :  { %20 = vst [vmem:[#allocation2] sm:$0x1] %v72_v0  ;;  %21 = vst [vmem:[#allocation3] sm:$0x1] %v72_v0  ;;  %v22_v1 = vld [vmem:[%s113_s0] sm:$0xff] }
   0x2   :  { %v24_v2 = vrot.slane %v22_v1, 4  ;;  %v33_v3 = vmul.f32 %v22_v1, %v22_v1  ;;  %v54_v27 = vld [vmem:[%s114_s1] sm:$0x1] }
   0x3   :  { %v57_v30 = vld [vmem:[%s115_s2] sm:$0x1] }
   0x4   :  { %v25_v4 = vadd.f32 %v24_v2, %v22_v1  ;;  %v34_v5 = vrot.slane %v33_v3, 4 }
   0x6   :  { %v26_v6 = vrot.slane %v25_v4, 2  ;;  %v35_v7 = vadd.f32 %v34_v5, %v33_v3 }
   0x8   :  { %v27_v8 = vadd.f32 %v26_v6, %v25_v4  ;;  %v36_v9 = vrot.slane %v35_v7, 2  ;;  %v23_v12 = vld [vmem:[#allocation2] sm:$0x1]  ;;  %v32_v15 = vld [vmem:[#allocation3] sm:$0x1] }
   0xa   :  { %v28_v10 = vrot.slane %v27_v8, 1  ;;  %v37_v11 = vadd.f32 %v36_v9, %v35_v7 }
   0xc   :  { %v29_v13 = vadd.f32 %v28_v10, %v27_v8  ;;  %v38_v14 = vrot.slane %v37_v11, 1 }
   0xe   :  { %v30_v16 = vadd.f32 %v29_v13, %v23_v12  ;;  %v39_v17 = vadd.f32 %v38_v14, %v37_v11 }
  0x10   :  { %31 = vst [vmem:[#allocation2] sm:$0x1] %v30_v16  ;;  %v40_v18 = vadd.f32 %v39_v17, %v32_v15 }
  0x12   :  { %41 = vst [vmem:[#allocation3] sm:$0x1] %v40_v18 }
  0x17   :  { %v45_v19 = vld [vmem:[#allocation2] sm:$0x1] }
  0x18   :  { %v46_v20 = vmul.f32 0.125, %v45_v19 }
  0x19   :  { %v47_v21 = vld [vmem:[#allocation3] sm:$0x1] }
  0x1a   :  { %v48_v22 = vmul.f32 0.125, %v47_v21  ;;  %v49_v23 = vmul.f32 %v46_v20, %v46_v20 }
  0x1c   :  { %v50_v24 = vsub.f32 %v48_v22, %v49_v23 }
  0x1e   :  { %v51_v25 = vmax.f32 %v50_v24, 0.0 }
  0x20   :  { %v52_v26 = vadd.f32 1e-05, %v51_v25 }
  0x22   :  { %70 = vrsqrt.f32 %v52_v26 }
  0x2c   :  { %v71_v28 = vpop.eup %70 }
  0x2d   :  { %v55_v29 = vmul.f32 %v71_v28, %v54_v27 }
  0x2f   :  { %56 = vst [vmem:[%s116_s3] sm:$0x1] %v55_v29  ;;  %v58_v31 = vmul.f32 %v55_v29, %v46_v20 }
  0x31   :  { %v59_v32 = vsub.f32 %v57_v30, %v58_v31 }
  0x33   :  { %60 = vst [vmem:[%s117_s4] sm:$0x1] %v59_v32 }

</bundles_post_ra>
